<compile_context>
chip_gen: v7x
topology: tpu7x:2x2x1
jax: 0.10.0
libtpu: 0.0.40
codegen_flags: <defaults>
</compile_context>

<pallas_src>
import jax
import jax.numpy as jnp
from jax.experimental import pallas as pl
from jax.experimental.pallas import tpu as pltpu

IN_DIM = 1
HIDDEN_DIM = 32
NUM_LAYERS = 5


# ----------------------------------------------------------------------------
# Fused Pallas kernel: whole DNDN forward for ONE graph per grid step.
# All operands fit in VMEM at these sizes (full-array weight blocks).
# ----------------------------------------------------------------------------
def dndn_kernel(x_ref, a_ref,
                w_init_ref, b_init_ref,
                wl_ref, bl_ref,
                w_heads_ref, b_heads_ref,
                w_d1_ref, b_d1_ref,
                out_ref):
    f32 = jnp.float32
    bf16 = jnp.bfloat16

    x = x_ref[0]                         # [N, in_dim] f32
    a = a_ref[0]                         # [2N, N]     bf16 (stacked [A_src; A_snk])
    n = x.shape[0]
    h2 = w_init_ref.shape[1]             # 2H  (source | sink packed along lanes)
    h = h2 // 2

    # --- initial Linear(in_dim -> H) for source & sink, packed along lanes ---
    if x.shape[1] == 1:
        # K=1 matmul == outer product: do it on the VPU, skip the MXU entirely.
        emb = x * w_init_ref[...] + b_init_ref[...]                  # [N, 2H]
    else:
        emb = (jnp.dot(x, w_init_ref[...], preferred_element_type=f32)
               + b_init_ref[...])

    # Lane mask selecting the source half (first H lanes). Hoisted out of loop.
    lane = jax.lax.broadcasted_iota(jnp.int32, (n, h2), 1)
    src_mask = lane < h

    # --- stack of SourceSinkEmbLayer -----------------------------------------
    # TODO(synk): SourceSinkEmbLayer source not provided with the reference;
    # implemented as GCN-style message passing with a residual:
    #     emb <- relu( (A @ emb) @ W + b + emb )     (dropout = identity, eval)
    for l in range(NUM_LAYERS):                      # static unroll (L = 5)
        # one [2N,N]@[N,2H] matmul yields source messages in rows 0:N and sink
        # messages in rows N:2N (bf16 operands, f32 accumulate).
        m = jnp.dot(a, emb.astype(bf16), preferred_element_type=f32)  # [2N, 2H]
        msg = jnp.where(src_mask, m[:n], m[n:])                       # [N, 2H]
        # block-diagonal [2H,2H] weight applies W_src / W_snk to each half.
        emb = jnp.maximum(
            jnp.dot(msg, wl_ref[l], preferred_element_type=f32)
            + bl_ref[l] + emb, 0.0)

    # --- combine_emb with combine='add' --------------------------------------
    combined = emb[:, :h] + emb[:, h:]                                # [N, H]

    # --- dim-0 heads: relu(Linear(combined)) for source & sink, averaged -----
    # fused into a single [H, 4] matmul (cols 0:2 = source head, 2:4 = sink).
    ho = jnp.maximum(
        jnp.dot(combined, w_heads_ref[...], preferred_element_type=f32)
        + b_heads_ref[...], 0.0)                                      # [N, 4]
    pd0 = (ho[:, 0:2] + ho[:, 2:4]) * 0.5                             # [N, 2]

    # --- dim-1 head -----------------------------------------------------------
    # TODO(synk): EdgeNeighborConv source not provided; implemented as neighbor
    # aggregation of the combined embedding along the given edges: A @ combined.
    m1 = jnp.dot(a, combined.astype(bf16), preferred_element_type=f32)  # [2N, H]
    comb1 = jnp.maximum(m1[:n], 0.0) + jnp.maximum(m1[n:], 0.0)          # [N, H]
    pd1 = jnp.maximum(
        jnp.dot(comb1, w_d1_ref[...], preferred_element_type=f32)
        + b_d1_ref[...], 0.0)                                            # [N, 2]

    # single lane-contiguous output: [pd_dim0 | pd_dim1]
    out_ref[0] = jnp.concatenate([pd0, pd1], axis=1)                     # [N, 4]


# ----------------------------------------------------------------------------
# Parameter init (deterministic, PyTorch-Linear-style uniform(-1/sqrt(fan_in)))
# ----------------------------------------------------------------------------
def _linear_init(key, fan_in, fan_out):
    kw, kb = jax.random.split(key)
    bound = 1.0 / float(max(fan_in, 1)) ** 0.5
    # PyTorch Linear stores weight as [out, in] and computes x @ W.T.
    w = jax.random.uniform(kw, (fan_out, fan_in), jnp.float32, -bound, bound)
    b = jax.random.uniform(kb, (fan_out,), jnp.float32, -bound, bound)
    return w, b


def init_dndn_params(key, in_dim=IN_DIM, hidden_dim=HIDDEN_DIM, num_layers=NUM_LAYERS):
    keys = jax.random.split(key, 5 + 2 * num_layers)
    params = {}
    params["source_initial"] = _linear_init(keys[0], in_dim, hidden_dim)
    params["sink_initial"] = _linear_init(keys[1], in_dim, hidden_dim)
    layer_src, layer_snk = [], []
    for i in range(num_layers):
        layer_src.append(_linear_init(keys[2 + 2 * i], hidden_dim, hidden_dim))
        layer_snk.append(_linear_init(keys[3 + 2 * i], hidden_dim, hidden_dim))
    params["layers_source"] = layer_src
    params["layers_sink"] = layer_snk
    params["source_out"] = _linear_init(keys[2 + 2 * num_layers], hidden_dim, 2)
    params["sink_out"] = _linear_init(keys[3 + 2 * num_layers], hidden_dim, 2)
    params["dim1_out"] = _linear_init(keys[4 + 2 * num_layers], hidden_dim, 2)
    return params


# ----------------------------------------------------------------------------
# Wrapper: adjacency densification, weight packing, pallas_call over a graph grid
# ----------------------------------------------------------------------------
def dndn_forward(x, source_edge_index, sink_edge_index, params):
    """
    x:                 [G, N, in_dim]  (or [N, in_dim] for a single graph)
    source_edge_index: [G, 2, E]       (or [2, E]) — node ids local to each graph
    sink_edge_index:   [G, 2, E]       (or [2, E])
    returns (pd_dim0 [G,N,2], pd_dim1 [G,N,2], final_pd [G,N,4])
    """
    f32, bf16 = jnp.float32, jnp.bfloat16

    squeeze = (x.ndim == 2)
    if squeeze:
        x = x[None]
        source_edge_index = source_edge_index[None]
        sink_edge_index = sink_edge_index[None]

    g_graphs, n, in_dim = x.shape

    # TODO(synk): for large graphs, keep edges sparse (scalar-prefetch page
    # tables / gather in-kernel) instead of materializing dense [N,N] adjacency.
    def dense_adj(edge_index):            # [2,E] -> [N,N], A[dst, src] += 1
        a = jnp.zeros((n, n), f32)
        return a.at[edge_index[1], edge_index[0]].add(1.0)

    a_src = jax.vmap(dense_adj)(source_edge_index)           # [G, N, N]
    a_snk = jax.vmap(dense_adj)(sink_edge_index)             # [G, N, N]
    # stacked adjacency -> one matmul produces both message sets (bf16 is exact
    # for small integer edge counts).
    a_stack = jnp.concatenate([a_src, a_snk], axis=1).astype(bf16)  # [G, 2N, N]

    def wk(wb):            # Linear weight [out,in] -> kernel layout [in,out]
        return jnp.transpose(wb[0])

    def bk(wb):            # bias [out] -> [1,out] for row broadcast
        return wb[1].reshape(1, -1)

    hidden = params["source_initial"][0].shape[0]
    num_layers = len(params["layers_source"])
    zero_hh = jnp.zeros((hidden, hidden), f32)

    # initial layers packed along lanes: [in_dim, 2H], [1, 2H]
    w_init = jnp.concatenate([wk(params["source_initial"]),
                              wk(params["sink_initial"])], axis=1)
    b_init = jnp.concatenate([bk(params["source_initial"]),
                              bk(params["sink_initial"])], axis=1)

    # per-layer block-diagonal weights [L, 2H, 2H] + packed biases [L, 1, 2H]
    wl = jnp.stack([
        jnp.block([[wk(ps), zero_hh], [zero_hh, wk(pk)]])
        for ps, pk in zip(params["layers_source"], params["layers_sink"])])
    bl = jnp.stack([
        jnp.concatenate([bk(ps), bk(pk)], axis=1)
        for ps, pk in zip(params["layers_source"], params["layers_sink"])])

    # fused dim-0 heads: [H, 4], [1, 4]
    w_heads = jnp.concatenate([wk(params["source_out"]),
                               wk(params["sink_out"])], axis=1)
    b_heads = jnp.concatenate([bk(params["source_out"]),
                               bk(params["sink_out"])], axis=1)
    w_d1 = wk(params["dim1_out"])                              # [H, 2]
    b_d1 = bk(params["dim1_out"])                              # [1, 2]

    h2 = 2 * hidden
    grid_spec = pltpu.PrefetchScalarGridSpec(
        num_scalar_prefetch=0,
        grid=(g_graphs,),
        in_specs=[
            pl.BlockSpec((1, n, in_dim),      lambda g: (g, 0, 0)),   # x
            pl.BlockSpec((1, 2 * n, n),       lambda g: (g, 0, 0)),   # A_stack
            pl.BlockSpec((in_dim, h2),        lambda g: (0, 0)),      # w_init
            pl.BlockSpec((1, h2),             lambda g: (0, 0)),      # b_init
            pl.BlockSpec((num_layers, h2, h2), lambda g: (0, 0, 0)),  # wl
            pl.BlockSpec((num_layers, 1, h2),  lambda g: (0, 0, 0)),  # bl
            pl.BlockSpec((hidden, 4),         lambda g: (0, 0)),      # w_heads
            pl.BlockSpec((1, 4),              lambda g: (0, 0)),      # b_heads
            pl.BlockSpec((hidden, 2),         lambda g: (0, 0)),      # w_d1
            pl.BlockSpec((1, 2),              lambda g: (0, 0)),      # b_d1
        ],
        out_specs=pl.BlockSpec((1, n, 4), lambda g: (g, 0, 0)),
    )

    final_pd = pl.pallas_call(
        dndn_kernel,
        out_shape=jax.ShapeDtypeStruct((g_graphs, n, 4), f32),
        grid_spec=grid_spec,
        compiler_params=pltpu.CompilerParams(
            dimension_semantics=("parallel",)),
    )(x.astype(f32), a_stack, w_init, b_init, wl, bl,
      w_heads, b_heads, w_d1, b_d1)

    pd_dim0 = final_pd[..., 0:2]
    pd_dim1 = final_pd[..., 2:4]
    if squeeze:
        return pd_dim0[0], pd_dim1[0], final_pd[0]
    return pd_dim0, pd_dim1, final_pd


# ----------------------------------------------------------------------------
if __name__ == "__main__":
    key = jax.random.PRNGKey(0)
    k_x, k_es, k_ed, k_ks, k_kd, k_p = jax.random.split(key, 6)

    G = 8           # graphs batched over the grid's "parallel" axis
    N = 32          # nodes per graph
    E = 64          # edges per (source / sink) edge list, per graph

    x = jax.random.normal(k_x, (G, N, IN_DIM), jnp.float32)
    source_edge_index = jnp.stack([
        jax.random.randint(k_es, (G, E), 0, N),
        jax.random.randint(k_ed, (G, E), 0, N),
    ], axis=1).astype(jnp.int32)                                     # [G, 2, E]
    sink_edge_index = jnp.stack([
        jax.random.randint(k_ks, (G, E), 0, N),
        jax.random.randint(k_kd, (G, E), 0, N),
    ], axis=1).astype(jnp.int32)                                     # [G, 2, E]

    params = init_dndn_params(k_p)

    fwd = jax.jit(dndn_forward)
    pd_dim0, pd_dim1, final_pd = fwd(
        x, source_edge_index, sink_edge_index, params)
    jax.block_until_ready((pd_dim0, pd_dim1, final_pd))

    assert pd_dim0.shape == (G, N, 2)
    assert pd_dim1.shape == (G, N, 2)
    assert final_pd.shape == (G, N, 4)
    print("KERNEL_OK")
</pallas_src>

<mosaic_0001>
module attributes {stable_mosaic.version = 11 : i64} {
  func.func private @main(%arg0: i32) attributes {dimension_semantics = [#tpu.dimension_semantics<core_parallel>], iteration_bounds = array<i64: 2>, tpu.core_type = #tpu.core_type<sc_scalar_subcore>, window_params = []} {
    return
  }
}

module attributes {stable_mosaic.version = 11 : i64} {
  func.func private @main(%arg0: i32) attributes {dimension_semantics = [#tpu.dimension_semantics<core_parallel>], iteration_bounds = array<i64: 2>, tpu.core_type = #tpu.core_type<sc_scalar_subcore>, window_params = []} {
    return
  }
}

module attributes {stable_mosaic.version = 11 : i64} {
  func.func @dndn_kernel(%arg0: i32, %arg1: memref<1x32x1xf32, #tpu.memory_space<vmem>>, %arg2: memref<1x64x32xbf16, #tpu.memory_space<vmem>>, %arg3: memref<1x64xf32, #tpu.memory_space<vmem>>, %arg4: memref<1x64xf32, #tpu.memory_space<vmem>>, %arg5: memref<5x64x64xf32, #tpu.memory_space<vmem>>, %arg6: memref<5x1x64xf32, #tpu.memory_space<vmem>>, %arg7: memref<32x4xf32, #tpu.memory_space<vmem>>, %arg8: memref<1x4xf32, #tpu.memory_space<vmem>>, %arg9: memref<32x2xf32, #tpu.memory_space<vmem>>, %arg10: memref<1x2xf32, #tpu.memory_space<vmem>>, %arg11: memref<1x32x4xf32, #tpu.memory_space<vmem>>) attributes {dimension_semantics = [#tpu.dimension_semantics<parallel>], iteration_bounds = array<i64: 8>, scalar_prefetch = 0 : i64, scratch_operands = 0 : i64, tpu.core_type = #tpu.core_type<tc>, window_params = [{transform_indices = @transform_0, window_bounds = array<i64: 1, 32, 1>}, {transform_indices = @transform_1, window_bounds = array<i64: 1, 64, 32>}, {pipeline_mode = #tpu.pipeline_mode<synchronous>, transform_indices = @transform_2, window_bounds = array<i64: 1, 64>}, {pipeline_mode = #tpu.pipeline_mode<synchronous>, transform_indices = @transform_3, window_bounds = array<i64: 1, 64>}, {pipeline_mode = #tpu.pipeline_mode<synchronous>, transform_indices = @transform_4, window_bounds = array<i64: 5, 64, 64>}, {pipeline_mode = #tpu.pipeline_mode<synchronous>, transform_indices = @transform_5, window_bounds = array<i64: 5, 1, 64>}, {pipeline_mode = #tpu.pipeline_mode<synchronous>, transform_indices = @transform_6, window_bounds = array<i64: 32, 4>}, {pipeline_mode = #tpu.pipeline_mode<synchronous>, transform_indices = @transform_7, window_bounds = array<i64: 1, 4>}, {pipeline_mode = #tpu.pipeline_mode<synchronous>, transform_indices = @transform_8, window_bounds = array<i64: 32, 2>}, {pipeline_mode = #tpu.pipeline_mode<synchronous>, transform_indices = @transform_9, window_bounds = array<i64: 1, 2>}, {transform_indices = @transform_10, window_bounds = array<i64: 1, 32, 4>}]} {
    %c0 = arith.constant 0 : index
    %c0_0 = arith.constant 0 : index
    %c0_1 = arith.constant 0 : index
    %0 = vector.load %arg1[%c0, %c0_0, %c0_1] : memref<1x32x1xf32, #tpu.memory_space<vmem>>, vector<1x32x1xf32>
    %1 = vector.shape_cast %0 : vector<1x32x1xf32> to vector<32x1xf32>
    %c0_2 = arith.constant 0 : index
    %c0_3 = arith.constant 0 : index
    %c0_4 = arith.constant 0 : index
    %2 = vector.load %arg2[%c0_2, %c0_3, %c0_4] : memref<1x64x32xbf16, #tpu.memory_space<vmem>>, vector<1x64x32xbf16>
    %3 = vector.shape_cast %2 : vector<1x64x32xbf16> to vector<64x32xbf16>
    %c0_5 = arith.constant 0 : index
    %c0_6 = arith.constant 0 : index
    %4 = vector.load %arg3[%c0_5, %c0_6] : memref<1x64xf32, #tpu.memory_space<vmem>>, vector<1x64xf32>
    %5 = vector.broadcast %1 : vector<32x1xf32> to vector<32x64xf32>
    %6 = vector.broadcast %4 : vector<1x64xf32> to vector<32x64xf32>
    %7 = arith.mulf %5, %6 : vector<32x64xf32>
    %c0_7 = arith.constant 0 : index
    %c0_8 = arith.constant 0 : index
    %8 = vector.load %arg4[%c0_7, %c0_8] : memref<1x64xf32, #tpu.memory_space<vmem>>, vector<1x64xf32>
    %9 = vector.broadcast %8 : vector<1x64xf32> to vector<32x64xf32>
    %10 = arith.addf %7, %9 : vector<32x64xf32>
    %11 = tpu.iota {dimensions = array<i32: 1>} : vector<32x64xi32>
    %c32_i32 = arith.constant 32 : i32
    %12 = vector.broadcast %c32_i32 : i32 to vector<32x64xi32>
    %13 = arith.cmpi slt, %11, %12 : vector<32x64xi32>
    %14 = arith.truncf %10 : vector<32x64xf32> to vector<32x64xbf16>
    %cst = arith.constant dense<0.000000e+00> : vector<64x64xf32>
    %15 = tpu.matmul %3, %14, %cst {dimension_numbers = #tpu.dot_dimension_numbers<[1], [0], [0], [1], [0, 0, 1, 1], [], []>} : vector<64x32xbf16>, vector<32x64xbf16>, vector<64x64xf32> -> vector<64x64xf32>
    %16 = vector.extract_strided_slice %15 {offsets = [0, 0], sizes = [32, 64], strides = [1, 1]} : vector<64x64xf32> to vector<32x64xf32>
    %17 = vector.extract_strided_slice %15 {offsets = [32, 0], sizes = [32, 64], strides = [1, 1]} : vector<64x64xf32> to vector<32x64xf32>
    %18 = arith.select %13, %16, %17 : vector<32x64xi1>, vector<32x64xf32>
    %c0_9 = arith.constant 0 : index
    %c0_10 = arith.constant 0 : index
    %c0_11 = arith.constant 0 : index
    %19 = vector.load %arg5[%c0_9, %c0_10, %c0_11] : memref<5x64x64xf32, #tpu.memory_space<vmem>>, vector<1x64x64xf32>
    %20 = vector.shape_cast %19 : vector<1x64x64xf32> to vector<64x64xf32>
    %cst_12 = arith.constant dense<0.000000e+00> : vector<32x64xf32>
    %21 = tpu.matmul %18, %20, %cst_12 {dimension_numbers = #tpu.dot_dimension_numbers<[1], [0], [0], [1], [0, 0, 1, 1], [], []>} : vector<32x64xf32>, vector<64x64xf32>, vector<32x64xf32> -> vector<32x64xf32>
    %c0_13 = arith.constant 0 : index
    %c0_14 = arith.constant 0 : index
    %c0_15 = arith.constant 0 : index
    %22 = vector.load %arg6[%c0_13, %c0_14, %c0_15] : memref<5x1x64xf32, #tpu.memory_space<vmem>>, vector<1x1x64xf32>
    %23 = vector.shape_cast %22 : vector<1x1x64xf32> to vector<1x64xf32>
    %24 = vector.broadcast %23 : vector<1x64xf32> to vector<32x64xf32>
    %25 = arith.addf %21, %24 : vector<32x64xf32>
    %26 = arith.addf %25, %10 : vector<32x64xf32>
    %cst_16 = arith.constant 0.000000e+00 : f32
    %27 = vector.broadcast %cst_16 : f32 to vector<32x64xf32>
    %28 = arith.maximumf %26, %27 : vector<32x64xf32>
    %29 = arith.truncf %28 : vector<32x64xf32> to vector<32x64xbf16>
    %cst_17 = arith.constant dense<0.000000e+00> : vector<64x64xf32>
    %30 = tpu.matmul %3, %29, %cst_17 {dimension_numbers = #tpu.dot_dimension_numbers<[1], [0], [0], [1], [0, 0, 1, 1], [], []>} : vector<64x32xbf16>, vector<32x64xbf16>, vector<64x64xf32> -> vector<64x64xf32>
    %31 = vector.extract_strided_slice %30 {offsets = [0, 0], sizes = [32, 64], strides = [1, 1]} : vector<64x64xf32> to vector<32x64xf32>
    %32 = vector.extract_strided_slice %30 {offsets = [32, 0], sizes = [32, 64], strides = [1, 1]} : vector<64x64xf32> to vector<32x64xf32>
    %33 = arith.select %13, %31, %32 : vector<32x64xi1>, vector<32x64xf32>
    %c1 = arith.constant 1 : index
    %c0_18 = arith.constant 0 : index
    %c0_19 = arith.constant 0 : index
    %34 = vector.load %arg5[%c1, %c0_18, %c0_19] : memref<5x64x64xf32, #tpu.memory_space<vmem>>, vector<1x64x64xf32>
    %35 = vector.shape_cast %34 : vector<1x64x64xf32> to vector<64x64xf32>
    %cst_20 = arith.constant dense<0.000000e+00> : vector<32x64xf32>
    %36 = tpu.matmul %33, %35, %cst_20 {dimension_numbers = #tpu.dot_dimension_numbers<[1], [0], [0], [1], [0, 0, 1, 1], [], []>} : vector<32x64xf32>, vector<64x64xf32>, vector<32x64xf32> -> vector<32x64xf32>
    %c1_21 = arith.constant 1 : index
    %c0_22 = arith.constant 0 : index
    %c0_23 = arith.constant 0 : index
    %37 = vector.load %arg6[%c1_21, %c0_22, %c0_23] : memref<5x1x64xf32, #tpu.memory_space<vmem>>, vector<1x1x64xf32>
    %38 = vector.shape_cast %37 : vector<1x1x64xf32> to vector<1x64xf32>
    %39 = vector.broadcast %38 : vector<1x64xf32> to vector<32x64xf32>
    %40 = arith.addf %36, %39 : vector<32x64xf32>
    %41 = arith.addf %40, %28 : vector<32x64xf32>
    %cst_24 = arith.constant 0.000000e+00 : f32
    %42 = vector.broadcast %cst_24 : f32 to vector<32x64xf32>
    %43 = arith.maximumf %41, %42 : vector<32x64xf32>
    %44 = arith.truncf %43 : vector<32x64xf32> to vector<32x64xbf16>
    %cst_25 = arith.constant dense<0.000000e+00> : vector<64x64xf32>
    %45 = tpu.matmul %3, %44, %cst_25 {dimension_numbers = #tpu.dot_dimension_numbers<[1], [0], [0], [1], [0, 0, 1, 1], [], []>} : vector<64x32xbf16>, vector<32x64xbf16>, vector<64x64xf32> -> vector<64x64xf32>
    %46 = vector.extract_strided_slice %45 {offsets = [0, 0], sizes = [32, 64], strides = [1, 1]} : vector<64x64xf32> to vector<32x64xf32>
    %47 = vector.extract_strided_slice %45 {offsets = [32, 0], sizes = [32, 64], strides = [1, 1]} : vector<64x64xf32> to vector<32x64xf32>
    %48 = arith.select %13, %46, %47 : vector<32x64xi1>, vector<32x64xf32>
    %c2 = arith.constant 2 : index
    %c0_26 = arith.constant 0 : index
    %c0_27 = arith.constant 0 : index
    %49 = vector.load %arg5[%c2, %c0_26, %c0_27] : memref<5x64x64xf32, #tpu.memory_space<vmem>>, vector<1x64x64xf32>
    %50 = vector.shape_cast %49 : vector<1x64x64xf32> to vector<64x64xf32>
    %cst_28 = arith.constant dense<0.000000e+00> : vector<32x64xf32>
    %51 = tpu.matmul %48, %50, %cst_28 {dimension_numbers = #tpu.dot_dimension_numbers<[1], [0], [0], [1], [0, 0, 1, 1], [], []>} : vector<32x64xf32>, vector<64x64xf32>, vector<32x64xf32> -> vector<32x64xf32>
    %c2_29 = arith.constant 2 : index
    %c0_30 = arith.constant 0 : index
    %c0_31 = arith.constant 0 : index
    %52 = vector.load %arg6[%c2_29, %c0_30, %c0_31] : memref<5x1x64xf32, #tpu.memory_space<vmem>>, vector<1x1x64xf32>
    %53 = vector.shape_cast %52 : vector<1x1x64xf32> to vector<1x64xf32>
    %54 = vector.broadcast %53 : vector<1x64xf32> to vector<32x64xf32>
    %55 = arith.addf %51, %54 : vector<32x64xf32>
    %56 = arith.addf %55, %43 : vector<32x64xf32>
    %cst_32 = arith.constant 0.000000e+00 : f32
    %57 = vector.broadcast %cst_32 : f32 to vector<32x64xf32>
    %58 = arith.maximumf %56, %57 : vector<32x64xf32>
    %59 = arith.truncf %58 : vector<32x64xf32> to vector<32x64xbf16>
    %cst_33 = arith.constant dense<0.000000e+00> : vector<64x64xf32>
    %60 = tpu.matmul %3, %59, %cst_33 {dimension_numbers = #tpu.dot_dimension_numbers<[1], [0], [0], [1], [0, 0, 1, 1], [], []>} : vector<64x32xbf16>, vector<32x64xbf16>, vector<64x64xf32> -> vector<64x64xf32>
    %61 = vector.extract_strided_slice %60 {offsets = [0, 0], sizes = [32, 64], strides = [1, 1]} : vector<64x64xf32> to vector<32x64xf32>
    %62 = vector.extract_strided_slice %60 {offsets = [32, 0], sizes = [32, 64], strides = [1, 1]} : vector<64x64xf32> to vector<32x64xf32>
    %63 = arith.select %13, %61, %62 : vector<32x64xi1>, vector<32x64xf32>
    %c3 = arith.constant 3 : index
    %c0_34 = arith.constant 0 : index
    %c0_35 = arith.constant 0 : index
    %64 = vector.load %arg5[%c3, %c0_34, %c0_35] : memref<5x64x64xf32, #tpu.memory_space<vmem>>, vector<1x64x64xf32>
    %65 = vector.shape_cast %64 : vector<1x64x64xf32> to vector<64x64xf32>
    %cst_36 = arith.constant dense<0.000000e+00> : vector<32x64xf32>
    %66 = tpu.matmul %63, %65, %cst_36 {dimension_numbers = #tpu.dot_dimension_numbers<[1], [0], [0], [1], [0, 0, 1, 1], [], []>} : vector<32x64xf32>, vector<64x64xf32>, vector<32x64xf32> -> vector<32x64xf32>
    %c3_37 = arith.constant 3 : index
    %c0_38 = arith.constant 0 : index
    %c0_39 = arith.constant 0 : index
    %67 = vector.load %arg6[%c3_37, %c0_38, %c0_39] : memref<5x1x64xf32, #tpu.memory_space<vmem>>, vector<1x1x64xf32>
    %68 = vector.shape_cast %67 : vector<1x1x64xf32> to vector<1x64xf32>
    %69 = vector.broadcast %68 : vector<1x64xf32> to vector<32x64xf32>
    %70 = arith.addf %66, %69 : vector<32x64xf32>
    %71 = arith.addf %70, %58 : vector<32x64xf32>
    %cst_40 = arith.constant 0.000000e+00 : f32
    %72 = vector.broadcast %cst_40 : f32 to vector<32x64xf32>
    %73 = arith.maximumf %71, %72 : vector<32x64xf32>
    %74 = arith.truncf %73 : vector<32x64xf32> to vector<32x64xbf16>
    %cst_41 = arith.constant dense<0.000000e+00> : vector<64x64xf32>
    %75 = tpu.matmul %3, %74, %cst_41 {dimension_numbers = #tpu.dot_dimension_numbers<[1], [0], [0], [1], [0, 0, 1, 1], [], []>} : vector<64x32xbf16>, vector<32x64xbf16>, vector<64x64xf32> -> vector<64x64xf32>
    %76 = vector.extract_strided_slice %75 {offsets = [0, 0], sizes = [32, 64], strides = [1, 1]} : vector<64x64xf32> to vector<32x64xf32>
    %77 = vector.extract_strided_slice %75 {offsets = [32, 0], sizes = [32, 64], strides = [1, 1]} : vector<64x64xf32> to vector<32x64xf32>
    %78 = arith.select %13, %76, %77 : vector<32x64xi1>, vector<32x64xf32>
    %c4 = arith.constant 4 : index
    %c0_42 = arith.constant 0 : index
    %c0_43 = arith.constant 0 : index
    %79 = vector.load %arg5[%c4, %c0_42, %c0_43] : memref<5x64x64xf32, #tpu.memory_space<vmem>>, vector<1x64x64xf32>
    %80 = vector.shape_cast %79 : vector<1x64x64xf32> to vector<64x64xf32>
    %cst_44 = arith.constant dense<0.000000e+00> : vector<32x64xf32>
    %81 = tpu.matmul %78, %80, %cst_44 {dimension_numbers = #tpu.dot_dimension_numbers<[1], [0], [0], [1], [0, 0, 1, 1], [], []>} : vector<32x64xf32>, vector<64x64xf32>, vector<32x64xf32> -> vector<32x64xf32>
    %c4_45 = arith.constant 4 : index
    %c0_46 = arith.constant 0 : index
    %c0_47 = arith.constant 0 : index
    %82 = vector.load %arg6[%c4_45, %c0_46, %c0_47] : memref<5x1x64xf32, #tpu.memory_space<vmem>>, vector<1x1x64xf32>
    %83 = vector.shape_cast %82 : vector<1x1x64xf32> to vector<1x64xf32>
    %84 = vector.broadcast %83 : vector<1x64xf32> to vector<32x64xf32>
    %85 = arith.addf %81, %84 : vector<32x64xf32>
    %86 = arith.addf %85, %73 : vector<32x64xf32>
    %cst_48 = arith.constant 0.000000e+00 : f32
    %87 = vector.broadcast %cst_48 : f32 to vector<32x64xf32>
    %88 = arith.maximumf %86, %87 : vector<32x64xf32>
    %89 = vector.extract_strided_slice %88 {offsets = [0, 0], sizes = [32, 32], strides = [1, 1]} : vector<32x64xf32> to vector<32x32xf32>
    %90 = vector.extract_strided_slice %88 {offsets = [0, 32], sizes = [32, 32], strides = [1, 1]} : vector<32x64xf32> to vector<32x32xf32>
    %91 = arith.addf %89, %90 : vector<32x32xf32>
    %c0_49 = arith.constant 0 : index
    %c0_50 = arith.constant 0 : index
    %92 = vector.load %arg7[%c0_49, %c0_50] : memref<32x4xf32, #tpu.memory_space<vmem>>, vector<32x4xf32>
    %cst_51 = arith.constant dense<0.000000e+00> : vector<32x4xf32>
    %93 = tpu.matmul %91, %92, %cst_51 {dimension_numbers = #tpu.dot_dimension_numbers<[1], [0], [0], [1], [0, 0, 1, 1], [], []>} : vector<32x32xf32>, vector<32x4xf32>, vector<32x4xf32> -> vector<32x4xf32>
    %c0_52 = arith.constant 0 : index
    %c0_53 = arith.constant 0 : index
    %94 = vector.load %arg8[%c0_52, %c0_53] : memref<1x4xf32, #tpu.memory_space<vmem>>, vector<1x4xf32>
    %95 = vector.broadcast %94 : vector<1x4xf32> to vector<32x4xf32>
    %96 = arith.addf %93, %95 : vector<32x4xf32>
    %cst_54 = arith.constant 0.000000e+00 : f32
    %97 = vector.broadcast %cst_54 : f32 to vector<32x4xf32>
    %98 = arith.maximumf %96, %97 : vector<32x4xf32>
    %99 = vector.extract_strided_slice %98 {offsets = [0, 0], sizes = [32, 2], strides = [1, 1]} : vector<32x4xf32> to vector<32x2xf32>
    %100 = vector.extract_strided_slice %98 {offsets = [0, 2], sizes = [32, 2], strides = [1, 1]} : vector<32x4xf32> to vector<32x2xf32>
    %101 = arith.addf %99, %100 : vector<32x2xf32>
    %cst_55 = arith.constant 5.000000e-01 : f32
    %102 = vector.broadcast %cst_55 : f32 to vector<32x2xf32>
    %103 = arith.mulf %101, %102 : vector<32x2xf32>
    %104 = arith.truncf %91 : vector<32x32xf32> to vector<32x32xbf16>
    %cst_56 = arith.constant dense<0.000000e+00> : vector<64x32xf32>
    %105 = tpu.matmul %3, %104, %cst_56 {dimension_numbers = #tpu.dot_dimension_numbers<[1], [0], [0], [1], [0, 0, 1, 1], [], []>} : vector<64x32xbf16>, vector<32x32xbf16>, vector<64x32xf32> -> vector<64x32xf32>
    %106 = vector.extract_strided_slice %105 {offsets = [0, 0], sizes = [32, 32], strides = [1, 1]} : vector<64x32xf32> to vector<32x32xf32>
    %cst_57 = arith.constant 0.000000e+00 : f32
    %107 = vector.broadcast %cst_57 : f32 to vector<32x32xf32>
    %108 = arith.maximumf %106, %107 : vector<32x32xf32>
    %109 = vector.extract_strided_slice %105 {offsets = [32, 0], sizes = [32, 32], strides = [1, 1]} : vector<64x32xf32> to vector<32x32xf32>
    %cst_58 = arith.constant 0.000000e+00 : f32
    %110 = vector.broadcast %cst_58 : f32 to vector<32x32xf32>
    %111 = arith.maximumf %109, %110 : vector<32x32xf32>
    %112 = arith.addf %108, %111 : vector<32x32xf32>
    %c0_59 = arith.constant 0 : index
    %c0_60 = arith.constant 0 : index
    %113 = vector.load %arg9[%c0_59, %c0_60] : memref<32x2xf32, #tpu.memory_space<vmem>>, vector<32x2xf32>
    %cst_61 = arith.constant dense<0.000000e+00> : vector<32x2xf32>
    %114 = tpu.matmul %112, %113, %cst_61 {dimension_numbers = #tpu.dot_dimension_numbers<[1], [0], [0], [1], [0, 0, 1, 1], [], []>} : vector<32x32xf32>, vector<32x2xf32>, vector<32x2xf32> -> vector<32x2xf32>
    %c0_62 = arith.constant 0 : index
    %c0_63 = arith.constant 0 : index
    %115 = vector.load %arg10[%c0_62, %c0_63] : memref<1x2xf32, #tpu.memory_space<vmem>>, vector<1x2xf32>
    %116 = vector.broadcast %115 : vector<1x2xf32> to vector<32x2xf32>
    %117 = arith.addf %114, %116 : vector<32x2xf32>
    %cst_64 = arith.constant 0.000000e+00 : f32
    %118 = vector.broadcast %cst_64 : f32 to vector<32x2xf32>
    %119 = arith.maximumf %117, %118 : vector<32x2xf32>
    %120 = tpu.concatenate %103, %119 in 1 : vector<32x2xf32>, vector<32x2xf32> -> vector<32x4xf32>
    %c0_65 = arith.constant 0 : index
    %c0_66 = arith.constant 0 : index
    %c0_67 = arith.constant 0 : index
    %121 = vector.load %arg11[%c0_65, %c0_66, %c0_67] : memref<1x32x4xf32, #tpu.memory_space<vmem>>, vector<1x32x4xf32>
    %122 = vector.shape_cast %121 : vector<1x32x4xf32> to vector<32x4xf32>
    %123 = vector.shape_cast %120 : vector<32x4xf32> to vector<1x32x4xf32>
    tpu.vector_store %arg11[%c0_65, %c0_66, %c0_67], %123 {strides = array<i32>} : memref<1x32x4xf32, #tpu.memory_space<vmem>>, vector<1x32x4xf32>,
    return
  }
  func.func @transform_0(%arg0: i32) -> (i32, i32, i32) {
    %c0_i32 = arith.constant 0 : i32
    %c0_i32_0 = arith.constant 0 : i32
    %c0_i32_1 = arith.constant 0 : i32
    return %arg0, %c0_i32, %c0_i32_0 : i32, i32, i32
  }
  func.func @transform_1(%arg0: i32) -> (i32, i32, i32) {
    %c0_i32 = arith.constant 0 : i32
    %c0_i32_0 = arith.constant 0 : i32
    %c0_i32_1 = arith.constant 0 : i32
    return %arg0, %c0_i32, %c0_i32_0 : i32, i32, i32
  }
  func.func @transform_2(%arg0: i32) -> (i32, i32) {
    %c0_i32 = arith.constant 0 : i32
    %c0_i32_0 = arith.constant 0 : i32
    %c0_i32_1 = arith.constant 0 : i32
    return %c0_i32, %c0_i32_0 : i32, i32
  }
  func.func @transform_3(%arg0: i32) -> (i32, i32) {
    %c0_i32 = arith.constant 0 : i32
    %c0_i32_0 = arith.constant 0 : i32
    %c0_i32_1 = arith.constant 0 : i32
    return %c0_i32, %c0_i32_0 : i32, i32
  }
  func.func @transform_4(%arg0: i32) -> (i32, i32, i32) {
    %c0_i32 = arith.constant 0 : i32
    %c0_i32_0 = arith.constant 0 : i32
    %c0_i32_1 = arith.constant 0 : i32
    %c0_i32_2 = arith.constant 0 : i32
    return %c0_i32, %c0_i32_0, %c0_i32_1 : i32, i32, i32
  }
  func.func @transform_5(%arg0: i32) -> (i32, i32, i32) {
    %c0_i32 = arith.constant 0 : i32
    %c0_i32_0 = arith.constant 0 : i32
    %c0_i32_1 = arith.constant 0 : i32
    %c0_i32_2 = arith.constant 0 : i32
    return %c0_i32, %c0_i32_0, %c0_i32_1 : i32, i32, i32
  }
  func.func @transform_6(%arg0: i32) -> (i32, i32) {
    %c0_i32 = arith.constant 0 : i32
    %c0_i32_0 = arith.constant 0 : i32
    %c0_i32_1 = arith.constant 0 : i32
    return %c0_i32, %c0_i32_0 : i32, i32
  }
  func.func @transform_7(%arg0: i32) -> (i32, i32) {
    %c0_i32 = arith.constant 0 : i32
    %c0_i32_0 = arith.constant 0 : i32
    %c0_i32_1 = arith.constant 0 : i32
    return %c0_i32, %c0_i32_0 : i32, i32
  }
  func.func @transform_8(%arg0: i32) -> (i32, i32) {
    %c0_i32 = arith.constant 0 : i32
    %c0_i32_0 = arith.constant 0 : i32
    %c0_i32_1 = arith.constant 0 : i32
    return %c0_i32, %c0_i32_0 : i32, i32
  }
  func.func @transform_9(%arg0: i32) -> (i32, i32) {
    %c0_i32 = arith.constant 0 : i32
    %c0_i32_0 = arith.constant 0 : i32
    %c0_i32_1 = arith.constant 0 : i32
    return %c0_i32, %c0_i32_0 : i32, i32
  }
  func.func @transform_10(%arg0: i32) -> (i32, i32, i32) {
    %c0_i32 = arith.constant 0 : i32
    %c0_i32_0 = arith.constant 0 : i32
    %c0_i32_1 = arith.constant 0 : i32
    return %arg0, %c0_i32, %c0_i32_0 : i32, i32, i32
  }
}

</mosaic_0001>

<bundles_post_ra>
// kernel: dndn_forward.1
= control target key start
LH: loop header
LB: loop body
LE: loop exit
PB: predicated region body
PF: predicated region fallthrough
CT: control target
= control target key end

     0   :  { %s2495_s13 = smov 0   ;;  %s2904_s0 = inlined_call_operand.vmem [shape: f32[8,32,1], index: 0, kind: input, shape index: {}]   ;;  %s2905_s1 = inlined_call_operand.vmem [shape: bf16[8,64,32], index: 1, kind: input, shape index: {}]   ;;  %s2906_s2 = inlined_call_operand.vmem [shape: f32[1,64], index: 2, kind: input, shape index: {}]   ;;  %s2907_s3 = inlined_call_operand.vmem [shape: f32[1,64], index: 3, kind: input, shape index: {}]   ;;  %s2908_s4 = inlined_call_operand.vmem [shape: f32[5,64,64], index: 4, kind: input, shape index: {}]   ;;  %s2909_s5 = inlined_call_operand.vmem [shape: f32[5,1,64], index: 5, kind: input, shape index: {}]   ;;  %s2910_s6 = inlined_call_operand.vmem [shape: f32[32,4], index: 6, kind: input, shape index: {}]   ;;  %s2911_s7 = inlined_call_operand.vmem [shape: f32[1,4], index: 7, kind: input, shape index: {}]   ;;  %s2912_s8 = inlined_call_operand.vmem [shape: f32[32,2], index: 8, kind: input, shape index: {}]   ;;  %s2913_s9 = inlined_call_operand.vmem [shape: f32[1,2], index: 9, kind: input, shape index: {}]   ;;  %s2914_s10 = inlined_call_operand.vmem [shape: f32[8,32,4], index: 10, kind: output, shape index: {}]  }
   0x1 LB: > { %s1875_s14 = sadd.s32 4294967295, %s2434_s13   ;;  %p1879_p0 = scmp.ge.s32.totalorder %s2434_s13, 1  ;;  %s2434_s13 = sphi %s2495_s13, %s20_s13  }
   0x2   : > { %p322_p1 = scmp.lt.s32.totalorder %s2434_s13, 9 }
   0x4   : > { %p323_p2 = pnand %p1879_p0, %p322_p1 }
   0x5   : > { %p365_p3 = scmp.lt.s32.totalorder (!%p323_p2), %s1875_s14, 7  ;;  %v2436_v0 = vmov (!%p323_p2), 0   ;;  %vm460_vm0 = vcmask (!%p323_p2), 261120   ;;  %v542_v6 = vld [vmem:[%s2908_s4] sm:$0xff] (!%p323_p2)  ;;  %v543_v7 = vld [vmem:[%s2908_s4 + $0x8] sm:$0xff] (!%p323_p2)  ;;  %v544_v28 = vld [vmem:[%s2908_s4 + $0x10] sm:$0xff] (!%p323_p2)  ;;  %v435_v37 = vlaneseq (!%p323_p2) }
   0x6   : > { %326 = sbr.rel (%p323_p2) target bundleno = 3110 (0xc26), region = 60  ;;  %2423 = vset.pattern.permute.xlu1 (!%p323_p2), %v2436_v0  ;;  %2422 = vset.pattern.permute.xlu0 (!%p323_p2), %v2436_v0  ;;  %v2314_v8 = vpack.c.bf16 (!%p323_p2), %v543_v7, %v542_v6  ;;  %v1886_v9 = vld [vmem:[%s2906_s2] ss:$0 sm:$0xff] (!%p323_p2)  ;;  %v545_v29 = vld [vmem:[%s2908_s4 + $0x18] sm:$0xff] (!%p323_p2)  ;;  %v547_v32 = vld [vmem:[%s2908_s4 + $0x28] sm:$0xff] (!%p323_p2)  ;;  %vm557_vm2 = vcmask (!%p323_p2), 523264  }
   0x7   : > { %v1887_v14 = vld [vmem:[%s2907_s3] ss:$0 sm:$0xff] (!%p323_p2)  ;;  %v2318_v30 = vpack.c.bf16 (!%p323_p2), %v545_v29, %v544_v28  ;;  %v548_v34 = vld [vmem:[%s2908_s4 + $0x30] sm:$0xff] (!%p323_p2)  ;;  %v549_v35 = vld [vmem:[%s2908_s4 + $0x38] sm:$0xff] (!%p323_p2)  ;;  %v2573_v41 = vand.u32 (!%p323_p2), 127, %v435_v37  ;;  %s2437_s16 = smov (!%p323_p2), 96  }
   0x8   : > { %2315 = vmatprep.subr.bf16.mxu1 (!%p323_p2), %v2314_v8  ;;  %v546_v31 = vld [vmem:[%s2908_s4 + $0x20] sm:$0xff] (!%p323_p2)  ;;  %v2326_v36 = vpack.c.bf16 (!%p323_p2), %v549_v35, %v548_v34  ;;  %v1906_v52 = vld [vmem:[%s2908_s4 + $0x48] sm:$0xff] (!%p323_p2)  ;;  %s2438_s27 = smov (!%p323_p2), 126   ;;  %s2439_s30 = smov (!%p323_p2), 2   ;;  %vm1798_vm3 = vcmask (!%p323_p2), 15360   ;;  %vm1803_vm4 = vcmask (!%p323_p2), 31744  }
   0x9   : > { %2317 = vmatpush3.bf16.msra.mxu1 (!%p323_p2), %v2314_v8  ;;  %v2322_v33 = vpack.c.bf16 (!%p323_p2), %v547_v32, %v546_v31  ;;  %vm437_vm1 = vcmp.lt.s32.totalorder (!%p323_p2), %v2573_v41, 32  ;;  %v1905_v51 = vld [vmem:[%s2908_s4 + $0x40] sm:$0xff] (!%p323_p2)  ;;  %v1924_v35 = vld [vmem:[%s2908_s4 + $0x88] sm:$0xff] (!%p323_p2)  ;;  %v1457_v41 = vld [vmem:[%s2910_s6 + $0x10] sm:$0xff] (!%p323_p2) }
   0xa   : > { %2319 = vmatprep.subr.bf16.mxu1 (!%p323_p2), %v2318_v30  ;;  %v2330_v53 = vpack.c.bf16 (!%p323_p2), %v1906_v52, %v1905_v51  ;;  %v1896_v54 = vld [vmem:[%s2909_s5] ss:$0 sm:$0xff] (!%p323_p2)  ;;  %v1914_v37 = vld [vmem:[%s2909_s5 + $0x1] ss:$0 sm:$0xff] (!%p323_p2) }
   0xb   : > { %v1923_v34 = vld [vmem:[%s2908_s4 + $0x80] sm:$0xff] (!%p323_p2) }
   0xd   : > { %s2916_s14 = smov (!%p365_p3, %s1875_s14), 7  ;;  %2321 = vmatpush3.bf16.msra.mxu1 %v2318_v30 }
   0xe   : > { %s2503_s15 = sshll.u32 %s2916_s14, 5  ;;  %2323 = vmatprep.subr.bf16.mxu1 %v2322_v33 }
   0xf   : > { %s369_s18 = scalar_lea.vmem %s2904_s0, %s2503_s15  ;;  %s2513_s21 = scalar_lea.vmem %s2905_s1, %s2503_s15 }
  0x10   : > { %v383_v1 = vld [vmem:[%s369_s18 + $0x10] sm:$0xff]  ;;  %v381_v2 = vld [vmem:[%s369_s18] sm:$0xff]  ;;  %v384_v3 = vld [vmem:[%s369_s18 + $0x18] sm:$0xff]  ;;  %s379_s14 = scalar_lea.vmem %s2914_s10, %s2503_s15 }
  0x11   : > { %406 = vperm.xlu1 %2423, %v383_v1   ;;  %396 = vperm.xlu0 %2422, %v381_v2   ;;  %v382_v4 = vld [vmem:[%s369_s18 + $0x8] sm:$0xff]  ;;  %v2516_v5 = vld [vmem:[%s2513_s21] sm:$0xff]   ;;  %v2542_v26 = vld [vmem:[%s2513_s21 + $0x10] sm:$0xff]  }
  0x12   : > { %2108 = vmatprep.mubr.msk.bf16.mxu0 %vm460_vm0, %v2516_v5  ;;  %v2539_v25 = vld [vmem:[%s2513_s21 + $0x8] sm:$0xff]   ;;  %v2549_v27 = vld [vmem:[%s2513_s21 + $0x18] sm:$0xff]   ;;  %2325 = vmatpush3.bf16.msra.mxu1 %v2322_v33 }
  0x13   : > { %2327 = vmatprep.subr.bf16.mxu1 %v2326_v36 }
  0x15   : > { %411 = vperm.xlu1 %2423, %v384_v3   ;;  %401 = vperm.xlu0 %2422, %v382_v4  }
  0x16   : > { %2329 = vmatpush3.bf16.msra.mxu1 %v2326_v36  ;;  %v2346_v36 = vpack.c.bf16 %v1924_v35, %v1923_v34 }
  0x17   : > { %2331 = vmatprep.subr.bf16.mxu1 %v2330_v53 }
  0x90   : > { %v407_v10 = vpop.permute.xlu1 %406  ;;  %v397_v11 = vpop.permute.xlu0 %396 }
  0x91   : > { %v422_v12 = vmul.f32 %v1886_v9, %v407_v10  ;;  %v420_v13 = vmul.f32 %v1886_v9, %v397_v11  ;;  %v1907_v10 = vld [vmem:[%s2908_s4 + $0x50] sm:$0xff]  ;;  %v1908_v11 = vld [vmem:[%s2908_s4 + $0x58] sm:$0xff] }
  0x93   : > { %v2532_v19 = vadd.f32 %v1887_v14, %v422_v12  ;;  %v431_v20 = vadd.f32 %v1887_v14, %v420_v13  ;;  %v2334_v12 = vpack.c.bf16 %v1908_v11, %v1907_v10  ;;  %v1909_v13 = vld [vmem:[%s2908_s4 + $0x60] sm:$0xff] }
  0x94   : > { %v412_v15 = vpop.permute.xlu1 %411  ;;  %v402_v16 = vpop.permute.xlu0 %401 }
  0x95   : > { %v423_v17 = vmul.f32 %v1886_v9, %v412_v15  ;;  %v421_v18 = vmul.f32 %v1886_v9, %v402_v16  ;;  %v1911_v16 = vld [vmem:[%s2908_s4 + $0x70] sm:$0xff] }
  0x97   : > { %v2534_v21 = vadd.f32 %v1887_v14, %v423_v17  ;;  %v432_v22 = vadd.f32 %v1887_v14, %v421_v18  ;;  %v1910_v14 = vld [vmem:[%s2908_s4 + $0x68] sm:$0xff]  ;;  %v1912_v17 = vld [vmem:[%s2908_s4 + $0x78] sm:$0xff] }
  0x98   : > { %v2338_v15 = vpack.c.bf16 %v1910_v14, %v1909_v13  ;;  %v2342_v18 = vpack.c.bf16 %v1912_v17, %v1911_v16  ;;  %v1942_v16 = vld [vmem:[%s2908_s4 + $0xc8] sm:$0xff] }
  0x99   : > { %v438_v23 = vpack.c.bf16 %v432_v22, %v431_v20  ;;  %v439_v24 = vpack.c.bf16 %v2534_v21, %v2532_v19 }
  0x9b   : > { %2104 = vmatprep.subr.bf16.mxu0 %v438_v23 }
  0x9c   : > { %2105 = vmatpush3.bf16.msra.mxu0 %v438_v23 }
  0x9d   : > { %2106 = vmatprep.subr.bf16.mxu0 %v439_v24 }
  0xa0   : > { %2107 = vmatpush3.bf16.msra.mxu0 %v439_v24 }
  0xa3   : > { %2109 = vmatmul.mubr.msk.bf16.vlgmr.msra.gmra.mrb[0].mxu0 %vm460_vm0, %v2539_v25 }
  0xa4   : > { %2112 = vmatprep.mubr.msk.bf16.mxu0 %vm460_vm0, %v2542_v26 }
  0xab   : > { %2113 = vmatmul.mubr.msk.bf16.gmra.mrb[4].mxu0 %vm460_vm0, %v2549_v27 }
  0xac   : > { %2142 = vmatprep.mubr.msk.bf16.mxu0 %vm460_vm0, %v2516_v5 }
 0x176   : > { %v2110_v38 = vpop.f32.mrb[0].mxu0 }
 0x177   : > { %v507_v39 = vpop.f32.mrb[1].mxu0 }
 0x178   : > { %v2111_v40 = vpop.f32.mrb[2].mxu0 }
 0x179   : > { %v510_v42 = vpop.f32.mrb[3].mxu0 }
 0x17e   : > { %v2114_v43 = vpop.f32.mrb[4].mxu0 }
 0x17f   : > { %v540_v44 = vsel %vm437_vm1, %v2110_v38, %v2114_v43  ;;  %v523_v45 = vpop.f32.mrb[5].mxu0 }
 0x180   : > { %v2115_v46 = vpop.f32.mrb[6].mxu0  ;;  %v538_v47 = vsel %vm437_vm1, %v507_v39, %v523_v45 }
 0x181   : > { %v541_v48 = vsel %vm437_vm1, %v2111_v40, %v2115_v46  ;;  %v526_v49 = vpop.f32.mrb[7].mxu0  ;;  %2132 = vmatprep.mubr.msk.f32.mxu1 %vm557_vm2, %v538_v47 }
 0x182   : > { %v539_v50 = vsel %vm437_vm1, %v510_v42, %v526_v49 }
 0x183   : > { %2133 = vmatmul.mubr.msk.f32.vlgmr.msra.gmra.mrb[0].mxu1 %vm557_vm2, %v539_v50 }
 0x184   : > { %2135 = vmatprep.mubr.msk.f32.mxu1 %vm557_vm2, %v540_v44  ;;  %2333 = vmatpush3.bf16.msra.mxu1 %v2330_v53 }
 0x185   : > { %2335 = vmatprep.subr.bf16.mxu1 %v2334_v12 }
 0x187   : > { %2136 = vmatmul.mubr.msk.f32.gmra.mrb[2].mxu1 %vm557_vm2, %v541_v48 }
 0x188   : > { %2337 = vmatpush3.bf16.msra.mxu1 %v2334_v12 }
 0x189   : > { %2339 = vmatprep.subr.bf16.mxu1 %v2338_v15 }
 0x18c   : > { %2341 = vmatpush3.bf16.msra.mxu1 %v2338_v15  ;;  %v1941_v15 = vld [vmem:[%s2908_s4 + $0xc0] sm:$0xff] }
 0x18d   : > { %2343 = vmatprep.subr.bf16.mxu1 %v2342_v18  ;;  %v2362_v17 = vpack.c.bf16 %v1942_v16, %v1941_v15 }
 0x190   : > { %2345 = vmatpush3.bf16.msra.mxu1 %v2342_v18  ;;  %v1932_v18 = vld [vmem:[%s2909_s5 + $0x2] ss:$0 sm:$0xff] }
 0x191   : > { %2347 = vmatprep.subr.bf16.mxu1 %v2346_v36 }
 0x256   : > { %v2134_v55 = vpop.f32.mrb[0].mxu1 }
 0x257   : > { %v642_v56 = vadd.f32 %v2134_v55, %v1896_v54  ;;  %v636_v57 = vpop.f32.mrb[1].mxu1 }
 0x258   : > { %v637_v58 = vadd.f32 %v1896_v54, %v636_v57  ;;  %v1925_v57 = vld [vmem:[%s2908_s4 + $0x90] sm:$0xff] }
 0x259   : > { %v2597_v59 = vadd.f32 %v642_v56, %v432_v22 }
 0x25a   : > { %v2599_v60 = vadd.f32 %v637_v58, %v431_v20  ;;  %v2137_v61 = vpop.f32.mrb[2].mxu1  ;;  %v1926_v58 = vld [vmem:[%s2908_s4 + $0x98] sm:$0xff] }
 0x25b   : > { %v660_v62 = vmax.f32 %v2597_v59, 0.0  ;;  %v652_v63 = vadd.f32 %v2137_v61, %v1896_v54  ;;  %v646_v0 = vpop.f32.mrb[3].mxu1  ;;  %v2350_v59 = vpack.c.bf16 %v1926_v58, %v1925_v57  ;;  %v1928_v61 = vld [vmem:[%s2908_s4 + $0xa8] sm:$0xff] }
 0x25c   : > { %v659_v1 = vmax.f32 %v2599_v60, 0.0  ;;  %v647_v2 = vadd.f32 %v1896_v54, %v646_v0  ;;  %v1927_v60 = vld [vmem:[%s2908_s4 + $0xa0] sm:$0xff]  ;;  %v1930_v0 = vld [vmem:[%s2908_s4 + $0xb8] sm:$0xff] }
 0x25d   : > { %v2604_v3 = vadd.f32 %v652_v63, %v2534_v21  ;;  %v1929_v63 = vld [vmem:[%s2908_s4 + $0xb0] sm:$0xff] }
 0x25e   : > { %v2607_v4 = vadd.f32 %v647_v2, %v2532_v19  ;;  %v663_v6 = vpack.c.bf16 %v660_v62, %v659_v1 }
 0x25f   : > { %v662_v7 = vmax.f32 %v2604_v3, 0.0 }
 0x260   : > { %v661_v8 = vmax.f32 %v2607_v4, 0.0  ;;  %2138 = vmatprep.subr.bf16.mxu0 %v663_v6 }
 0x261   : > { %2139 = vmatpush3.bf16.msra.mxu0 %v663_v6 }
 0x262   : > { %v664_v9 = vpack.c.bf16 %v662_v7, %v661_v8 }
 0x264   : > { %2140 = vmatprep.subr.bf16.mxu0 %v664_v9 }
 0x265   : > { %2141 = vmatpush3.bf16.msra.mxu0 %v664_v9 }
 0x268   : > { %2143 = vmatmul.mubr.msk.bf16.vlgmr.msra.gmra.mrb[8].mxu0 %vm460_vm0, %v2539_v25 }
 0x269   : > { %2146 = vmatprep.mubr.msk.bf16.mxu0 %vm460_vm0, %v2542_v26 }
 0x270   : > { %2147 = vmatmul.mubr.msk.bf16.gmra.mrb[12].mxu0 %vm460_vm0, %v2549_v27 }
 0x271   : > { %2176 = vmatprep.mubr.msk.bf16.mxu0 %vm460_vm0, %v2516_v5 }
 0x33b   : > { %v2144_v19 = vpop.f32.mrb[8].mxu0 }
 0x33c   : > { %v699_v20 = vpop.f32.mrb[9].mxu0 }
 0x33d   : > { %v2145_v21 = vpop.f32.mrb[10].mxu0 }
 0x33e   : > { %v702_v22 = vpop.f32.mrb[11].mxu0 }
 0x343   : > { %v2148_v23 = vpop.f32.mrb[12].mxu0 }
 0x344   : > { %v732_v24 = vsel %vm437_vm1, %v2144_v19, %v2148_v23  ;;  %v715_v28 = vpop.f32.mrb[13].mxu0 }
 0x345   : > { %v730_v29 = vsel %vm437_vm1, %v699_v20, %v715_v28  ;;  %v2149_v30 = vpop.f32.mrb[14].mxu0 }
 0x346   : > { %v733_v31 = vsel %vm437_vm1, %v2145_v21, %v2149_v30  ;;  %v718_v32 = vpop.f32.mrb[15].mxu0  ;;  %2166 = vmatprep.mubr.msk.f32.mxu1 %vm557_vm2, %v730_v29 }
 0x347   : > { %v731_v33 = vsel %vm437_vm1, %v702_v22, %v718_v32 }
 0x348   : > { %2167 = vmatmul.mubr.msk.f32.vlgmr.msra.gmra.mrb[4].mxu1 %vm557_vm2, %v731_v33 }
 0x349   : > { %2169 = vmatprep.mubr.msk.f32.mxu1 %vm557_vm2, %v732_v24  ;;  %2349 = vmatpush3.bf16.msra.mxu1 %v2346_v36 }
 0x34a   : > { %2351 = vmatprep.subr.bf16.mxu1 %v2350_v59 }
 0x34c   : > { %2170 = vmatmul.mubr.msk.f32.gmra.mrb[6].mxu1 %vm557_vm2, %v733_v31 }
 0x34d   : > { %2353 = vmatpush3.bf16.msra.mxu1 %v2350_v59 }
 0x41b   : > { %v2168_v38 = vpop.f32.mrb[4].mxu1 }
 0x41c   : > { %v835_v39 = vadd.f32 %v2168_v38, %v1914_v37  ;;  %v829_v40 = vpop.f32.mrb[5].mxu1 }
 0x41d   : > { %v830_v42 = vadd.f32 %v1914_v37, %v829_v40  ;;  %v1943_v40 = vld [vmem:[%s2908_s4 + $0xd0] sm:$0xff] }
 0x41e   : > { %v2658_v43 = vadd.f32 %v835_v39, %v660_v62  ;;  %v2354_v62 = vpack.c.bf16 %v1928_v61, %v1927_v60 }
 0x41f   : > { %v2660_v44 = vadd.f32 %v830_v42, %v659_v1  ;;  %v2171_v45 = vpop.f32.mrb[6].mxu1  ;;  %v2358_v1 = vpack.c.bf16 %v1930_v0, %v1929_v63  ;;  %v1944_v42 = vld [vmem:[%s2908_s4 + $0xd8] sm:$0xff]  ;;  %v1960_v63 = vld [vmem:[%s2908_s4 + $0x108] sm:$0xff]  ;;  %v1961_v0 = vld [vmem:[%s2908_s4 + $0x110] sm:$0xff] }
 0x420   : > { %v853_v46 = vmax.f32 %v2658_v43, 0.0  ;;  %v845_v47 = vadd.f32 %v2171_v45, %v1914_v37  ;;  %v839_v48 = vpop.f32.mrb[7].mxu1  ;;  %2355 = vmatprep.subr.bf16.mxu1 %v2354_v62  ;;  %v2366_v43 = vpack.c.bf16 %v1944_v42, %v1943_v40  ;;  %v1946_v45 = vld [vmem:[%s2908_s4 + $0xe8] sm:$0xff] }
 0x421   : > { %v852_v49 = vmax.f32 %v2660_v44, 0.0  ;;  %v840_v50 = vadd.f32 %v1914_v37, %v839_v48  ;;  %2357 = vmatpush3.bf16.msra.mxu1 %v2354_v62  ;;  %v1945_v44 = vld [vmem:[%s2908_s4 + $0xe0] sm:$0xff]  ;;  %v1948_v48 = vld [vmem:[%s2908_s4 + $0xf8] sm:$0xff] }
 0x422   : > { %v2664_v51 = vadd.f32 %v845_v47, %v662_v7  ;;  %2359 = vmatprep.subr.bf16.mxu1 %v2358_v1  ;;  %v1947_v47 = vld [vmem:[%s2908_s4 + $0xf0] sm:$0xff]  ;;  %v1959_v62 = vld [vmem:[%s2908_s4 + $0x100] sm:$0xff] }
 0x423   : > { %v2666_v52 = vadd.f32 %v840_v50, %v661_v8  ;;  %v856_v53 = vpack.c.bf16 %v853_v46, %v852_v49 }
 0x424   : > { %v855_v54 = vmax.f32 %v2664_v51, 0.0 }
 0x425   : > { %v854_v55 = vmax.f32 %v2666_v52, 0.0  ;;  %2172 = vmatprep.subr.bf16.mxu0 %v856_v53  ;;  %2361 = vmatpush3.bf16.msra.mxu1 %v2358_v1  ;;  %v2378_v1 = vpack.c.bf16 %v1960_v63, %v1959_v62 }
 0x426   : > { %2173 = vmatpush3.bf16.msra.mxu0 %v856_v53  ;;  %2363 = vmatprep.subr.bf16.mxu1 %v2362_v17 }
 0x427   : > { %v857_v56 = vpack.c.bf16 %v855_v54, %v854_v55 }
 0x429   : > { %2174 = vmatprep.subr.bf16.mxu0 %v857_v56 }
 0x42a   : > { %2175 = vmatpush3.bf16.msra.mxu0 %v857_v56 }
 0x42d   : > { %2177 = vmatmul.mubr.msk.bf16.vlgmr.msra.gmra.mrb[16].mxu0 %vm460_vm0, %v2539_v25 }
 0x42e   : > { %2180 = vmatprep.mubr.msk.bf16.mxu0 %vm460_vm0, %v2542_v26 }
 0x435   : > { %2181 = vmatmul.mubr.msk.bf16.gmra.mrb[20].mxu0 %vm460_vm0, %v2549_v27 }
 0x436   : > { %2210 = vmatprep.mubr.msk.bf16.mxu0 %vm460_vm0, %v2516_v5 }
 0x500   : > { %v2178_v2 = vpop.f32.mrb[16].mxu0 }
 0x501   : > { %v892_v3 = vpop.f32.mrb[17].mxu0 }
 0x502   : > { %v2179_v4 = vpop.f32.mrb[18].mxu0 }
 0x503   : > { %v895_v6 = vpop.f32.mrb[19].mxu0 }
 0x508   : > { %v2182_v7 = vpop.f32.mrb[20].mxu0 }
 0x509   : > { %v925_v8 = vsel %vm437_vm1, %v2178_v2, %v2182_v7  ;;  %v908_v9 = vpop.f32.mrb[21].mxu0  ;;  %v1962_v2 = vld [vmem:[%s2908_s4 + $0x118] sm:$0xff] }
 0x50a   : > { %v923_v10 = vsel %vm437_vm1, %v892_v3, %v908_v9  ;;  %v2183_v11 = vpop.f32.mrb[22].mxu0  ;;  %v2382_v3 = vpack.c.bf16 %v1962_v2, %v1961_v0 }
 0x50b   : > { %v926_v12 = vsel %vm437_vm1, %v2179_v4, %v2183_v11  ;;  %v911_v13 = vpop.f32.mrb[23].mxu0  ;;  %2200 = vmatprep.mubr.msk.f32.mxu1 %vm557_vm2, %v923_v10  ;;  %v1950_v4 = vld [vmem:[%s2909_s5 + $0x3] ss:$0 sm:$0xff] }
 0x50c   : > { %v924_v14 = vsel %vm437_vm1, %v895_v6, %v911_v13 }
 0x50d   : > { %2201 = vmatmul.mubr.msk.f32.vlgmr.msra.gmra.mrb[8].mxu1 %vm557_vm2, %v924_v14 }
 0x50e   : > { %2203 = vmatprep.mubr.msk.f32.mxu1 %vm557_vm2, %v925_v8  ;;  %2365 = vmatpush3.bf16.msra.mxu1 %v2362_v17 }
 0x50f   : > { %2367 = vmatprep.subr.bf16.mxu1 %v2366_v43 }
 0x511   : > { %2204 = vmatmul.mubr.msk.f32.gmra.mrb[10].mxu1 %vm557_vm2, %v926_v12 }
 0x512   : > { %2369 = vmatpush3.bf16.msra.mxu1 %v2366_v43 }
 0x5e0   : > { %v2202_v19 = vpop.f32.mrb[8].mxu1 }
 0x5e1   : > { %v1028_v20 = vadd.f32 %v2202_v19, %v1932_v18  ;;  %v1022_v21 = vpop.f32.mrb[9].mxu1 }
 0x5e2   : > { %v1023_v22 = vadd.f32 %v1932_v18, %v1022_v21 }
 0x5e3   : > { %v2717_v23 = vadd.f32 %v1028_v20, %v853_v46  ;;  %v2370_v46 = vpack.c.bf16 %v1946_v45, %v1945_v44 }
 0x5e4   : > { %v2719_v24 = vadd.f32 %v1023_v22, %v852_v49  ;;  %v2205_v28 = vpop.f32.mrb[10].mxu1  ;;  %v2374_v49 = vpack.c.bf16 %v1948_v48, %v1947_v47  ;;  %v1456_v47 = vld [vmem:[%s2910_s6 + $0x8] sm:$0xff] }
 0x5e5   : > { %v1046_v29 = vmax.f32 %v2717_v23, 0.0  ;;  %v1038_v30 = vadd.f32 %v2205_v28, %v1932_v18  ;;  %v1032_v31 = vpop.f32.mrb[11].mxu1  ;;  %2371 = vmatprep.subr.bf16.mxu1 %v2370_v46  ;;  %v1964_v28 = vld [vmem:[%s2908_s4 + $0x128] sm:$0xff] }
 0x5e6   : > { %v1045_v32 = vmax.f32 %v2719_v24, 0.0  ;;  %v1033_v33 = vadd.f32 %v1932_v18, %v1032_v31  ;;  %2373 = vmatpush3.bf16.msra.mxu1 %v2370_v46  ;;  %v1963_v24 = vld [vmem:[%s2908_s4 + $0x120] sm:$0xff]  ;;  %v1966_v31 = vld [vmem:[%s2908_s4 + $0x138] sm:$0xff] }
 0x5e7   : > { %v2723_v34 = vadd.f32 %v1038_v30, %v855_v54  ;;  %2375 = vmatprep.subr.bf16.mxu1 %v2374_v49  ;;  %v1965_v30 = vld [vmem:[%s2908_s4 + $0x130] sm:$0xff]  ;;  %v1455_v46 = vld [vmem:[%s2910_s6] sm:$0xff] }
 0x5e8   : > { %v2725_v35 = vadd.f32 %v1033_v33, %v854_v55  ;;  %v1049_v36 = vpack.c.bf16 %v1046_v29, %v1045_v32  ;;  %v2394_v48 = vpack.c.bf16 %v1456_v47, %v1455_v46 }
 0x5e9   : > { %v1048_v37 = vmax.f32 %v2723_v34, 0.0 }
 0x5ea   : > { %v1047_v38 = vmax.f32 %v2725_v35, 0.0  ;;  %2206 = vmatprep.subr.bf16.mxu0 %v1049_v36  ;;  %2377 = vmatpush3.bf16.msra.mxu1 %v2374_v49  ;;  %v1458_v49 = vld [vmem:[%s2910_s6 + $0x18] sm:$0xff] }
 0x5eb   : > { %2207 = vmatpush3.bf16.msra.mxu0 %v1049_v36  ;;  %2379 = vmatprep.subr.bf16.mxu1 %v2378_v1 }
 0x5ec   : > { %v1050_v39 = vpack.c.bf16 %v1048_v37, %v1047_v38 }
 0x5ee   : > { %2208 = vmatprep.subr.bf16.mxu0 %v1050_v39 }
 0x5ef   : > { %2209 = vmatpush3.bf16.msra.mxu0 %v1050_v39 }
 0x5f2   : > { %2211 = vmatmul.mubr.msk.bf16.vlgmr.msra.gmra.mrb[24].mxu0 %vm460_vm0, %v2539_v25 }
 0x5f3   : > { %2214 = vmatprep.mubr.msk.bf16.mxu0 %vm460_vm0, %v2542_v26 }
 0x5fa   : > { %2215 = vmatmul.mubr.msk.bf16.gmra.mrb[28].mxu0 %vm460_vm0, %v2549_v27 }
 0x5fb   : > { %2244 = vmatprep.mubr.msk.bf16.mxu0 %vm460_vm0, %v2516_v5 }
 0x6c5   : > { %v2212_v50 = vpop.f32.mrb[24].mxu0 }
 0x6c6   : > { %v1085_v51 = vpop.f32.mrb[25].mxu0 }
 0x6c7   : > { %v2213_v52 = vpop.f32.mrb[26].mxu0 }
 0x6c8   : > { %v1088_v53 = vpop.f32.mrb[27].mxu0 }
 0x6cd   : > { %v2216_v54 = vpop.f32.mrb[28].mxu0 }
 0x6ce   : > { %v1118_v55 = vsel %vm437_vm1, %v2212_v50, %v2216_v54  ;;  %v1101_v56 = vpop.f32.mrb[29].mxu0  ;;  %v1968_v50 = vld [vmem:[%s2909_s5 + $0x4] ss:$0 sm:$0xff] }
 0x6cf   : > { %v1116_v57 = vsel %vm437_vm1, %v1085_v51, %v1101_v56  ;;  %v2217_v58 = vpop.f32.mrb[30].mxu0 }
 0x6d0   : > { %v1119_v59 = vsel %vm437_vm1, %v2213_v52, %v2217_v58  ;;  %v1104_v60 = vpop.f32.mrb[31].mxu0  ;;  %2234 = vmatprep.mubr.msk.f32.mxu1 %vm557_vm2, %v1116_v57 }
 0x6d1   : > { %v1117_v61 = vsel %vm437_vm1, %v1088_v53, %v1104_v60 }
 0x6d2   : > { %2235 = vmatmul.mubr.msk.f32.vlgmr.msra.gmra.mrb[12].mxu1 %vm557_vm2, %v1117_v61 }
 0x6d3   : > { %2237 = vmatprep.mubr.msk.f32.mxu1 %vm557_vm2, %v1118_v55  ;;  %2381 = vmatpush3.bf16.msra.mxu1 %v2378_v1 }
 0x6d4   : > { %2383 = vmatprep.subr.bf16.mxu1 %v2382_v3 }
 0x6d6   : > { %2238 = vmatmul.mubr.msk.f32.gmra.mrb[14].mxu1 %vm557_vm2, %v1119_v59 }
 0x6d7   : > { %2385 = vmatpush3.bf16.msra.mxu1 %v2382_v3 }
 0x7a5   : > { %v2236_v6 = vpop.f32.mrb[12].mxu1 }
 0x7a6   : > { %v1221_v7 = vadd.f32 %v2236_v6, %v1950_v4  ;;  %v1215_v8 = vpop.f32.mrb[13].mxu1 }
 0x7a7   : > { %v1216_v9 = vadd.f32 %v1950_v4, %v1215_v8 }
 0x7a8   : > { %v2792_v10 = vadd.f32 %v1221_v7, %v1046_v29  ;;  %v2386_v29 = vpack.c.bf16 %v1964_v28, %v1963_v24 }
 0x7a9   : > { %v2796_v11 = vadd.f32 %v1216_v9, %v1045_v32  ;;  %v2239_v12 = vpop.f32.mrb[14].mxu1  ;;  %v2390_v32 = vpack.c.bf16 %v1966_v31, %v1965_v30 }
 0x7aa   : > { %v1239_v13 = vmax.f32 %v2792_v10, 0.0  ;;  %v1231_v14 = vadd.f32 %v2239_v12, %v1950_v4  ;;  %v1225_v15 = vpop.f32.mrb[15].mxu1  ;;  %2387 = vmatprep.subr.bf16.mxu1 %v2386_v29 }
 0x7ab   : > { %v1238_v16 = vmax.f32 %v2796_v11, 0.0  ;;  %v1226_v17 = vadd.f32 %v1950_v4, %v1225_v15  ;;  %2389 = vmatpush3.bf16.msra.mxu1 %v2386_v29  ;;  %v1671_v15 = vld [vmem:[%s2912_s8 + $0x8] sm:$0xff] }
 0x7ac   : > { %v2802_v18 = vadd.f32 %v1231_v14, %v1048_v37  ;;  %2391 = vmatprep.subr.bf16.mxu1 %v2390_v32  ;;  %v1670_v14 = vld [vmem:[%s2912_s8] sm:$0xff] }
 0x7ad   : > { %v2806_v19 = vadd.f32 %v1226_v17, %v1047_v38  ;;  %v1242_v20 = vpack.c.bf16 %v1239_v13, %v1238_v16  ;;  %v1973_v17 = vld [vmem:[%s2911_s7] ss:$0 sm:$0xff] }
 0x7ae   : > { %v1241_v21 = vmax.f32 %v2802_v18, 0.0 }
 0x7af   : > { %v1240_v22 = vmax.f32 %v2806_v19, 0.0  ;;  %2240 = vmatprep.subr.bf16.mxu0 %v1242_v20  ;;  %2393 = vmatpush3.bf16.msra.mxu1 %v2390_v32 }
 0x7b0   : > { %2241 = vmatpush3.bf16.msra.mxu0 %v1242_v20 }
 0x7b1   : > { %v1243_v23 = vpack.c.bf16 %v1241_v21, %v1240_v22 }
 0x7b3   : > { %2242 = vmatprep.subr.bf16.mxu0 %v1243_v23 }
 0x7b4   : > { %2243 = vmatpush3.bf16.msra.mxu0 %v1243_v23 }
 0x7b5   : > { %2395 = vmatprep.subr.bf16.mxu0 %v2394_v48 }
 0x7b7   : > { %2245 = vmatmul.mubr.msk.bf16.vlgmr.msra.gmra.mrb[32].mxu0 %vm460_vm0, %v2539_v25 }
 0x7b8   : > { %2248 = vmatprep.mubr.msk.bf16.mxu0 %vm460_vm0, %v2542_v26  ;;  %2397 = vmatpush3.bf16.msra.mxu0 %v2394_v48 }
 0x7bf   : > { %2249 = vmatmul.mubr.msk.bf16.gmra.mrb[36].mxu0 %vm460_vm0, %v2549_v27 }
 0x88a   : > { %v2246_v33 = vpop.f32.mrb[32].mxu0 }
 0x88b   : > { %v1278_v34 = vpop.f32.mrb[33].mxu0 }
 0x88c   : > { %v2247_v35 = vpop.f32.mrb[34].mxu0 }
 0x88d   : > { %v1281_v36 = vpop.f32.mrb[35].mxu0 }
 0x892   : > { %v2250_v37 = vpop.f32.mrb[36].mxu0 }
 0x893   : > { %v1311_v38 = vsel %vm437_vm1, %v2246_v33, %v2250_v37  ;;  %v1294_v39 = vpop.f32.mrb[37].mxu0 }
 0x894   : > { %v1309_v40 = vsel %vm437_vm1, %v1278_v34, %v1294_v39  ;;  %v2251_v42 = vpop.f32.mrb[38].mxu0 }
 0x895   : > { %v1312_v43 = vsel %vm437_vm1, %v2247_v35, %v2251_v42  ;;  %v1297_v44 = vpop.f32.mrb[39].mxu0  ;;  %2268 = vmatprep.mubr.msk.f32.mxu1 %vm557_vm2, %v1309_v40 }
 0x896   : > { %v1310_v45 = vsel %vm437_vm1, %v1281_v36, %v1297_v44 }
 0x897   : > { %2269 = vmatmul.mubr.msk.f32.vlgmr.msra.gmra.mrb[16].mxu1 %vm557_vm2, %v1310_v45 }
 0x898   : > { %2271 = vmatprep.mubr.msk.f32.mxu1 %vm557_vm2, %v1311_v38 }
 0x89b   : > { %2272 = vmatmul.mubr.msk.f32.gmra.mrb[18].mxu1 %vm557_vm2, %v1312_v43 }
 0x89c   : > { %2292 = vmatprep.mubr.msk.bf16.mxu1 %vm460_vm0, %v2516_v5  ;;  %v2398_v5 = vpack.c.bf16 %v1458_v49, %v1457_v41 }
 0x89e   : > { %2399 = vmatprep.subr.bf16.mxu0 %v2398_v5 }
 0x89f   : > { %2401 = vmatpush3.bf16.msra.mxu0 %v2398_v5 }
 0x96a   : > { %v2270_v51 = vpop.f32.mrb[16].mxu1 }
 0x96b   : > { %v1414_v52 = vadd.f32 %v2270_v51, %v1968_v50  ;;  %v1408_v53 = vpop.f32.mrb[17].mxu1 }
 0x96c   : > { %v1409_v54 = vadd.f32 %v1968_v50, %v1408_v53 }
 0x96d   : > { %v1428_v55 = vadd.f32 %v1414_v52, %v1239_v13  ;;  %v1982_v52 = vld [vmem:[%s2913_s9] ss:$0 sm:$0xff] }
 0x96e   : > { %v1427_v56 = vadd.f32 %v1409_v54, %v1238_v16  ;;  %v2273_v57 = vpop.f32.mrb[18].mxu1  ;;  %v2402_v16 = vpack.c.bf16 %v1671_v15, %v1670_v14 }
 0x96f   : > { %v1432_v58 = vmax.f32 %v1428_v55, 0.0  ;;  %v1424_v59 = vadd.f32 %v2273_v57, %v1968_v50  ;;  %v1418_v60 = vpop.f32.mrb[19].mxu1 }
 0x970   : > { %v1431_v61 = vmax.f32 %v1427_v56, 0.0  ;;  %v1419_v62 = vadd.f32 %v1968_v50, %v1418_v60  ;;  %2403 = vmatprep.subr.bf16.mxu0 %v2402_v16 }
 0x971   : > { %v1430_v63 = vadd.f32 %v1424_v59, %v1241_v21  ;;  %1441 = vrot.lane.b32.xlu1 %v1432_v58, %s2437_s16 }
 0x972   : > { %v1429_v0 = vadd.f32 %v1419_v62, %v1240_v22  ;;  %1439 = vrot.lane.b32.xlu0 %v1431_v61, %s2437_s16 }
 0x973   : > { %v1434_v1 = vmax.f32 %v1430_v63, 0.0 }
 0x974   : > { %v1433_v2 = vmax.f32 %v1429_v0, 0.0 }
 0x975   : > { %1445 = vrot.lane.b32.xlu1 %v1434_v1, %s2437_s16 }
 0x976   : > { %1443 = vrot.lane.b32.xlu0 %v1433_v2, %s2437_s16 }
 0x9e3   : > { %v1442_v3 = vpop.permute.xlu1 %1441 }
 0x9e4   : > { %v1452_v4 = vadd.f32 %v1442_v3, %v1432_v58  ;;  %v1440_v6 = vpop.permute.xlu0 %1439 }
 0x9e5   : > { %v1451_v7 = vadd.f32 %v1440_v6, %v1431_v61 }
 0x9e7   : > { %v1591_v8 = vpack.c.bf16 %v1452_v4, %v1451_v7  ;;  %v1446_v9 = vpop.permute.xlu1 %1445  ;;  %2282 = vmatprep.mubr.msk.f32.mxu0 %vm460_vm0, %v1451_v7 }
 0x9e8   : > { %v1454_v10 = vadd.f32 %v1446_v9, %v1434_v1  ;;  %2283 = vmatmul.mubr.msk.f32.vlgmr.msra.gmra.mrb[40].mxu0 %vm460_vm0, %v1452_v4  ;;  %v1444_v11 = vpop.permute.xlu0 %1443 }
 0x9e9   : > { %v1453_v12 = vadd.f32 %v1444_v11, %v1433_v2  ;;  %2288 = vmatprep.subr.bf16.mxu1 %v1591_v8  ;;  %2405 = vmatpush3.bf16.msra.mxu0 %v2402_v16 }
 0x9ea   : > { %2289 = vmatpush3.bf16.msra.mxu1 %v1591_v8 }
 0x9eb   : > { %v1592_v13 = vpack.c.bf16 %v1454_v10, %v1453_v12  ;;  %2285 = vmatprep.mubr.msk.f32.mxu0 %vm460_vm0, %v1453_v12 }
 0x9ec   : > { %2286 = vmatmul.mubr.msk.f32.gmra.mrb[42].mxu0 %vm460_vm0, %v1454_v10 }
 0x9ed   : > { %2290 = vmatprep.subr.bf16.mxu1 %v1592_v13 }
 0x9ee   : > { %2291 = vmatpush3.bf16.msra.mxu1 %v1592_v13 }
 0x9f1   : > { %2293 = vmatmul.mubr.msk.bf16.vlgmr.msra.gmra.mrb[20].mxu1 %vm460_vm0, %v2539_v25  ;;  %v1672_v25 = vld [vmem:[%s2912_s8 + $0x10] sm:$0xff] }
 0x9f2   : > { %2296 = vmatprep.mubr.msk.bf16.mxu1 %vm460_vm0, %v2542_v26  ;;  %v1673_v26 = vld [vmem:[%s2912_s8 + $0x18] sm:$0xff] }
 0x9f9   : > { %2297 = vmatmul.mubr.msk.bf16.gmra.mrb[24].mxu1 %vm460_vm0, %v2549_v27  ;;  %v2406_v27 = vpack.c.bf16 %v1673_v26, %v1672_v25 }
 0x9fb   : > { %2407 = vmatprep.subr.bf16.mxu0 %v2406_v27 }
 0x9fc   : > { %2409 = vmatpush3.bf16.msra.mxu0 %v2406_v27 }
 0xabb   : > { %v2284_v18 = vpop.f32.mrb[40].mxu0 }
 0xabc   : > { %v1550_v19 = vadd.f32 %v2284_v18, %v1973_v17  ;;  %v1544_v20 = vpop.f32.mrb[41].mxu0 }
 0xabd   : > { %v1545_v21 = vadd.f32 %v1973_v17, %v1544_v20 }
 0xabe   : > { %v1564_v22 = vmax.f32 %v1550_v19, 0.0 }
 0xabf   : > { %v1563_v23 = vmax.f32 %v1545_v21, 0.0  ;;  %v2287_v24 = vpop.f32.mrb[42].mxu0 }
 0xac0   : > { %v1560_v28 = vadd.f32 %v2287_v24, %v1973_v17  ;;  %1573 = vrot.lane.b32.xlu1 %v1564_v22, %s2438_s27  ;;  %v1554_v29 = vpop.f32.mrb[43].mxu0 }
 0xac1   : > { %v1555_v30 = vadd.f32 %v1973_v17, %v1554_v29  ;;  %1571 = vrot.lane.b32.xlu0 %v1563_v23, %s2438_s27 }
 0xac2   : > { %v1566_v31 = vmax.f32 %v1560_v28, 0.0 }
 0xac3   : > { %v1565_v32 = vmax.f32 %v1555_v30, 0.0 }
 0xac4   : > { %1577 = vrot.lane.b32.xlu1 %v1566_v31, %s2438_s27  ;;  %v2294_v33 = vpop.f32.mrb[20].mxu1 }
 0xac5   : > { %1575 = vrot.lane.b32.xlu0 %v1565_v32, %s2438_s27  ;;  %v1627_v34 = vpop.f32.mrb[21].mxu1  ;;  %v1660_v38 = vmax.f32 %v2294_v33, 0.0 }
 0xac6   : > { %v2295_v35 = vpop.f32.mrb[22].mxu1  ;;  %v1658_v42 = vmax.f32 %v1627_v34, 0.0 }
 0xac7   : > { %v1630_v36 = vpop.f32.mrb[23].mxu1  ;;  %v1661_v45 = vmax.f32 %v2295_v35, 0.0 }
 0xac8   : > { %v1659_v41 = vmax.f32 %v1630_v36, 0.0 }
 0xacc   : > { %v2298_v37 = vpop.f32.mrb[24].mxu1 }
 0xacd   : > { %v1664_v39 = vmax.f32 %v2298_v37, 0.0  ;;  %v1643_v40 = vpop.f32.mrb[25].mxu1 }
 0xace   : > { %v1662_v43 = vmax.f32 %v1643_v40, 0.0  ;;  %v2299_v44 = vpop.f32.mrb[26].mxu1 }
 0xacf   : > { %v1668_v46 = vadd.f32 %v1664_v39, %v1660_v38  ;;  %v1665_v47 = vmax.f32 %v2299_v44, 0.0  ;;  %v1646_v48 = vpop.f32.mrb[27].mxu1 }
 0xad0   : > { %v1666_v49 = vadd.f32 %v1662_v43, %v1658_v42  ;;  %v1663_v5 = vmax.f32 %v1646_v48, 0.0 }
 0xad1   : > { %v1669_v50 = vadd.f32 %v1665_v47, %v1661_v45 }
 0xad2   : > { %v1667_v51 = vadd.f32 %v1663_v5, %v1659_v41  ;;  %2308 = vmatprep.mubr.msk.f32.mxu0 %vm460_vm0, %v1666_v49 }
 0xad4   : > { %2309 = vmatmul.mubr.msk.f32.vlgmr.msra.gmra.mrb[44].mxu0 %vm460_vm0, %v1667_v51 }
 0xad5   : > { %2311 = vmatprep.mubr.msk.f32.mxu0 %vm460_vm0, %v1668_v46 }
 0xad8   : > { %2312 = vmatmul.mubr.msk.f32.gmra.mrb[46].mxu0 %vm460_vm0, %v1669_v50 }
 0xb32   : > { %v1574_v1 = vpop.permute.xlu1 %1573 }
 0xb33   : > { %v1572_v2 = vpop.permute.xlu0 %1571  ;;  %v1584_v3 = vadd.f32 %v1574_v1, %v1564_v22 }
 0xb34   : > { %v1583_v4 = vadd.f32 %v1572_v2, %v1563_v23 }
 0xb35   : > { %v1588_v8 = vmul.f32 0.5, %v1584_v3 }
 0xb36   : > { %v1578_v6 = vpop.permute.xlu1 %1577  ;;  %v1587_v10 = vmul.f32 0.5, %v1583_v4 }
 0xb37   : > { %v1576_v7 = vpop.permute.xlu0 %1575  ;;  %v1586_v9 = vadd.f32 %v1578_v6, %v1566_v31 }
 0xb38   : > { %v1585_v11 = vadd.f32 %v1576_v7, %v1565_v32 }
 0xb39   : > { %v1590_v16 = vmul.f32 0.5, %v1586_v9 }
 0xb3a   : > { %v1589_v25 = vmul.f32 0.5, %v1585_v11 }
 0xba7   : > { %v2310_v53 = vpop.f32.mrb[44].mxu0 }
 0xba8   : > { %v1765_v54 = vadd.f32 %v2310_v53, %v1982_v52  ;;  %v1759_v55 = vpop.f32.mrb[45].mxu0 }
 0xba9   : > { %v1760_v56 = vadd.f32 %v1982_v52, %v1759_v55 }
 0xbaa   : > { %v1779_v57 = vmax.f32 %v1765_v54, 0.0 }
 0xbab   : > { %v1778_v58 = vmax.f32 %v1760_v56, 0.0  ;;  %v2313_v59 = vpop.f32.mrb[46].mxu0 }
 0xbac   : > { %v1775_v60 = vadd.f32 %v2313_v59, %v1982_v52  ;;  %1788 = vrot.lane.b32.xlu1 %v1779_v57, %s2439_s30  ;;  %v1769_v61 = vpop.f32.mrb[47].mxu0 }
 0xbad   : > { %v1770_v62 = vadd.f32 %v1982_v52, %v1769_v61  ;;  %1786 = vrot.lane.b32.xlu0 %v1778_v58, %s2439_s30 }
 0xbae   : > { %v1781_v63 = vmax.f32 %v1775_v60, 0.0 }
 0xbaf   : > { %v1780_v0 = vmax.f32 %v1770_v62, 0.0 }
 0xbb0   : > { %1792 = vrot.lane.b32.xlu1 %v1781_v63, %s2439_s30 }
 0xbb1   : > { %1790 = vrot.lane.b32.xlu0 %v1780_v0, %s2439_s30 }
 0xc1e   : > { %v1789_v12 = vpop.permute.xlu1 %1788 }
 0xc1f   : > { %v1800_v13 = vsel %vm1798_vm3, %v1588_v8, %v1789_v12  ;;  %v1787_v14 = vpop.permute.xlu0 %1786 }
 0xc20   : > { %1805 = vst.msk [vmem:[%s379_s14 + $0x8] sm:$0xff] %vm1803_vm4, %v1800_v13  ;;  %v1799_v15 = vsel %vm1798_vm3, %v1587_v10, %v1787_v14 }
 0xc21   : > { %1804 = vst.msk [vmem:[%s379_s14] sm:$0xff] %vm1803_vm4, %v1799_v15 }
 0xc22   : > { %v1793_v26 = vpop.permute.xlu1 %1792 }
 0xc23   : > { %v1802_v27 = vsel %vm1798_vm3, %v1590_v16, %v1793_v26  ;;  %v1791_v17 = vpop.permute.xlu0 %1790 }
 0xc24   : > { %1807 = vst.msk [vmem:[%s379_s14 + $0x18] sm:$0xff] %vm1803_vm4, %v1802_v27  ;;  %v1801_v18 = vsel %vm1798_vm3, %v1589_v25, %v1791_v17 }
 0xc25   : > { %1806 = vst.msk [vmem:[%s379_s14 + $0x10] sm:$0xff] %vm1803_vm4, %v1801_v18 }
 0xc26 PF: > { %s20_s13 = sadd.s32 1, %s2434_s13  }
 0xc27   : > { %p17_p4 = scmp.ge.s32.totalorder %s20_s13, 10  }
 0xc29   :  { %19 = sbr.rel (!%p17_p4) target bundleno = 1 (0x1), region = 101 }

</bundles_post_ra>
